<compile_context>
chip_gen: v7x
topology: tpu7x:2x2x1
jax: 0.10.0
libtpu: 0.0.40
codegen_flags: <defaults>
</compile_context>

<pallas_src>
import functools

import jax
import jax.numpy as jnp
import numpy as np
from jax.experimental import pallas as pl
from jax.experimental.pallas import tpu as pltpu


# ----------------------------------------------------------------------------
# Small helpers
# ----------------------------------------------------------------------------
def _round_up(x, m):
    return (x + m - 1) // m * m


def _cpad(c):
    """Persistent channel padding: activations are stored with 128-mult chans."""
    return _round_up(c, 128)


def _pick_row_tile(m):
    m8 = _round_up(m, 8)
    for t in (512, 256, 128):
        if m8 % t == 0:
            return t
    return min(256, m8)


def _pick_col_tile(n):
    if n % 256 == 0:
        return 256
    if n % 128 == 0:
        return 128
    return n


_SINGLE_K_MAX = 2304  # single full-K step up to here (covers all but layer4 3x3)


def _vmem_limit_bytes(tm, tkb, tn, out_itemsize, has_residual, multi_k):
    need = 2 * tm * tkb * 2          # x blocks, double-buffered, bf16
    need += 2 * tkb * tn * 2         # w blocks
    need += 2 * tm * tn * out_itemsize
    if has_residual:
        need += 2 * tm * tn * 2
    if multi_k:
        need += tm * tn * 4          # f32 accumulator
    need += 2 << 20                  # scale/shift + internal scratch slack
    return int(min(max(2 * need, 32 << 20), 48 << 20))


# ----------------------------------------------------------------------------
# Pallas kernels
# ----------------------------------------------------------------------------
def _matmul_fused_kernel(*refs, relu, has_residual, multi_k):
    """Tiled matmul + fused (scale, shift, optional residual add, optional ReLU).

    refs = (x, w, scale, shift[, residual], out[, acc_scratch])
      x     : (tm, tk)  bf16
      w     : (tk, tn)  bf16
      scale : (1, tn)   f32  (folded BN scale; ones for plain Linear)
      shift : (1, tn)   f32  (folded BN shift / bias)
      res   : (tm, tn)  bf16 residual                              [optional]
      out   : (tm, tn)  out dtype (bf16 for convs, f32 for fc)
      acc   : (tm, tn)  f32 VMEM accumulator (multi-K path only)
    """
    if multi_k:
        refs, acc_ref = refs[:-1], refs[-1]
    if has_residual:
        x_ref, w_ref, scale_ref, shift_ref, res_ref, o_ref = refs
    else:
        x_ref, w_ref, scale_ref, shift_ref, o_ref = refs
        res_ref = None

    def epilogue(acc):
        y = acc * scale_ref[...] + shift_ref[...]
        if has_residual:
            y = y + res_ref[...].astype(jnp.float32)
        if relu:
            y = jnp.maximum(y, 0.0)
        o_ref[...] = y.astype(o_ref.dtype)

    if not multi_k:
        epilogue(jnp.dot(x_ref[...], w_ref[...],
                         preferred_element_type=jnp.float32))
    else:
        k = pl.program_id(2)

        @pl.when(k == 0)
        def _():
            acc_ref[...] = jnp.zeros_like(acc_ref)

        acc_ref[...] += jnp.dot(x_ref[...], w_ref[...],
                                preferred_element_type=jnp.float32)

        @pl.when(k == pl.num_programs(2) - 1)
        def _():
            epilogue(acc_ref[...])


def _max_over_taps_kernel(x_ref, o_ref):
    # x block: (tm, 9, C) -> max over the tap axis.
    o_ref[...] = jnp.max(x_ref[...], axis=1)


def _mean_over_axis1_kernel(x_ref, o_ref):
    # x block: (B, HW, tc) bf16 -> f32 mean over the spatial axis.
    o_ref[...] = jnp.mean(x_ref[...].astype(jnp.float32), axis=1)


# ----------------------------------------------------------------------------
# Fused matmul wrapper
# ----------------------------------------------------------------------------
def matmul_bn_act(x, w, scale, shift, residual=None, relu=False,
                  out_dtype=jnp.bfloat16):
    """y = act((x @ w) * scale + shift [+ residual]); f32 MXU accumulation.

    x: (M, K) bf16, w: (K, N) bf16, scale/shift: (1, N) f32, residual: (M, N)
    bf16.  N is expected channel-padded (mult of 128) by preprocess_params.
    """
    M, K = x.shape
    Kw, N = w.shape
    assert Kw == K, (Kw, K)
    assert scale.shape == (1, N) and shift.shape == (1, N)

    tm = _pick_row_tile(M)
    Mp = _round_up(M, tm)
    if Mp != M:
        x = jnp.pad(x, ((0, Mp - M), (0, 0)))
        if residual is not None:
            residual = jnp.pad(residual, ((0, Mp - M), (0, 0)))

    tn = _pick_col_tile(N)

    multi_k = K > _SINGLE_K_MAX
    if multi_k:
        tk = 512
        Kp = _round_up(K, tk)
        if Kp != K:
            x = jnp.pad(x, ((0, 0), (0, Kp - K)))
            w = jnp.pad(w, ((0, Kp - K), (0, 0)))
    else:
        tk, Kp = K, K

    has_residual = residual is not None

    if multi_k:
        grid = (Mp // tm, N // tn, Kp // tk)
        x_spec = pl.BlockSpec((tm, tk), lambda i, j, k: (i, k))
        w_spec = pl.BlockSpec((tk, tn), lambda i, j, k: (k, j))
        v_spec = pl.BlockSpec((1, tn), lambda i, j, k: (0, j))
        r_spec = pl.BlockSpec((tm, tn), lambda i, j, k: (i, j))
        o_spec = pl.BlockSpec((tm, tn), lambda i, j, k: (i, j))
        scratch = [pltpu.VMEM((tm, tn), jnp.float32)]
        semantics = ("parallel", "parallel", "arbitrary")
    else:
        grid = (Mp // tm, N // tn)
        x_spec = pl.BlockSpec((tm, Kp), lambda i, j: (i, 0))
        w_spec = pl.BlockSpec((Kp, tn), lambda i, j: (0, j))
        v_spec = pl.BlockSpec((1, tn), lambda i, j: (0, j))
        r_spec = pl.BlockSpec((tm, tn), lambda i, j: (i, j))
        o_spec = pl.BlockSpec((tm, tn), lambda i, j: (i, j))
        scratch = []
        semantics = ("parallel", "parallel")

    in_specs = [x_spec, w_spec, v_spec, v_spec]
    operands = [x, w, scale.astype(jnp.float32), shift.astype(jnp.float32)]
    if has_residual:
        in_specs.append(r_spec)
        operands.append(residual)

    out = pl.pallas_call(
        functools.partial(_matmul_fused_kernel, relu=relu,
                          has_residual=has_residual, multi_k=multi_k),
        grid=grid,
        in_specs=in_specs,
        out_specs=o_spec,
        out_shape=jax.ShapeDtypeStruct((Mp, N), out_dtype),
        scratch_shapes=scratch,
        compiler_params=pltpu.CompilerParams(
            dimension_semantics=semantics,
            vmem_limit_bytes=_vmem_limit_bytes(
                tm, tk, tn, jnp.dtype(out_dtype).itemsize, has_residual,
                multi_k)),
    )(*operands)
    return out if Mp == M else out[:M]


# ----------------------------------------------------------------------------
# Conv / pooling wrappers (data reorg in XLA, compute in Pallas)
# ----------------------------------------------------------------------------
def _extract_patches(x, kh, kw, stride, pad, pad_value=0.0):
    """x: (B,H,W,C) -> ((B,OH,OW,kh*kw,C), OH, OW); taps stacked at axis=3."""
    B, H, W, C = x.shape
    if pad:
        x = jnp.pad(x, ((0, 0), (pad, pad), (pad, pad), (0, 0)),
                    constant_values=pad_value)
    Hp, Wp = H + 2 * pad, W + 2 * pad
    OH = (Hp - kh) // stride + 1
    OW = (Wp - kw) // stride + 1
    taps = []
    for dh in range(kh):
        for dw in range(kw):
            taps.append(jax.lax.slice(
                x, (0, dh, dw, 0),
                (B, dh + stride * (OH - 1) + 1, dw + stride * (OW - 1) + 1, C),
                (1, stride, stride, 1)))
    return jnp.stack(taps, axis=3), OH, OW


def conv_bn_act(x, p, *, kh, kw, stride, pad, relu, residual=None):
    """Conv (one fused matmul) + folded BN + optional residual + ReLU (bf16 io).

    x channels are already padded to match the preprocessed weight's K layout;
    the output keeps its channels padded (persistent padding, no slicing).
    """
    B = x.shape[0]
    n_out = p["w"].shape[1]
    if kh == 1 and kw == 1:
        if stride != 1:
            x = x[:, ::stride, ::stride, :]
        _, OH, OW, C = x.shape
        cols = x.reshape(B * OH * OW, C)
    else:
        patches, OH, OW = _extract_patches(x, kh, kw, stride, pad)
        cols = patches.reshape(B * OH * OW, kh * kw * x.shape[-1])
    res2d = None if residual is None else residual.reshape(B * OH * OW, n_out)
    y = matmul_bn_act(cols, p["w"], p["scale"], p["shift"],
                      residual=res2d, relu=relu, out_dtype=jnp.bfloat16)
    return y.reshape(B, OH, OW, n_out)


def maxpool_3x3_s2(x):
    """3x3 stride-2 maxpool, pad 1; row-tiled Pallas reduction over the taps."""
    B, H, W, C = x.shape
    patches, OH, OW = _extract_patches(x, 3, 3, 2, 1, pad_value=-jnp.inf)
    M = B * OH * OW
    cols = patches.reshape(M, 9, C)
    tm = _pick_row_tile(M)
    Mp = _round_up(M, tm)
    if Mp != M:
        cols = jnp.pad(cols, ((0, Mp - M), (0, 0), (0, 0)))
    out = pl.pallas_call(
        _max_over_taps_kernel,
        grid=(Mp // tm,),
        in_specs=[pl.BlockSpec((tm, 9, C), lambda i: (i, 0, 0))],
        out_specs=pl.BlockSpec((tm, C), lambda i: (i, 0)),
        out_shape=jax.ShapeDtypeStruct((Mp, C), x.dtype),
        compiler_params=pltpu.CompilerParams(
            dimension_semantics=("parallel",)),
    )(cols)
    if Mp != M:
        out = out[:M]
    return out.reshape(B, OH, OW, C)


def global_avgpool(x):
    """(B,H,W,C) bf16 -> (B,C) f32 mean over spatial; channel-tiled."""
    B, H, W, C = x.shape
    xr = x.reshape(B, H * W, C)
    tc = _pick_col_tile(C)
    return pl.pallas_call(
        _mean_over_axis1_kernel,
        grid=(C // tc,),
        in_specs=[pl.BlockSpec((B, H * W, tc), lambda j: (0, 0, j))],
        out_specs=pl.BlockSpec((B, tc), lambda j: (0, j)),
        out_shape=jax.ShapeDtypeStruct((B, C), jnp.float32),
        compiler_params=pltpu.CompilerParams(
            dimension_semantics=("parallel",)),
    )(xr)


# ----------------------------------------------------------------------------
# CNN_Encoder forward (ResNet-50 backbone -> flatten -> fc -> dropout[eval])
# ----------------------------------------------------------------------------
def _bottleneck(x, blk, stride):
    identity = x
    out = conv_bn_act(x, blk["conv1"], kh=1, kw=1, stride=1, pad=0, relu=True)
    out = conv_bn_act(out, blk["conv2"], kh=3, kw=3, stride=stride, pad=1,
                      relu=True)
    if blk["down"] is not None:
        identity = conv_bn_act(x, blk["down"], kh=1, kw=1, stride=stride,
                               pad=0, relu=False)
    # relu(bn3(conv3(out)) + identity), all fused into the matmul epilogue.
    return conv_bn_act(out, blk["conv3"], kh=1, kw=1, stride=1, pad=0,
                       relu=True, residual=identity)


def cnn_encoder_forward(pparams, images, *, embed_size):
    """images: (B, 3, H, W) float32 (PyTorch NCHW) -> (B, embed_size) f32."""
    x = jnp.transpose(images, (0, 2, 3, 1)).astype(jnp.bfloat16)   # NHWC bf16
    x = conv_bn_act(x, pparams["conv1"], kh=7, kw=7, stride=2, pad=3,
                    relu=True)
    x = maxpool_3x3_s2(x)
    for layer, s in zip(pparams["layers"], (1, 2, 2, 2)):
        for bi, blk in enumerate(layer):
            x = _bottleneck(x, blk, stride=s if bi == 0 else 1)
    feats = global_avgpool(x)                                       # (B, 2048)
    # flatten: already (B, 2048).  fc as fused Pallas matmul with bias.
    out = matmul_bn_act(feats.astype(jnp.bfloat16), pparams["fc"]["w"],
                        pparams["fc"]["scale"], pparams["fc"]["shift"],
                        relu=False, out_dtype=jnp.float32)
    # dropout(0.5) is identity in eval mode.
    return out[:, :embed_size]


# ----------------------------------------------------------------------------
# Parameters: PyTorch-style init + one-time preprocessing
# ----------------------------------------------------------------------------
def _conv_bn_params(key, kh, kw, cin, cout):
    k1, k2, k3, k4, k5 = jax.random.split(key, 5)
    fan_in = kh * kw * cin
    return {
        "w": jax.random.normal(k1, (cout, cin, kh, kw), jnp.float32)
             * np.sqrt(2.0 / fan_in),                              # OIHW
        "gamma": jax.random.uniform(k2, (cout,), jnp.float32, 0.9, 1.1),
        "beta": jax.random.uniform(k3, (cout,), jnp.float32, -0.1, 0.1),
        "mean": jax.random.normal(k4, (cout,), jnp.float32) * 0.1,
        "var": jax.random.uniform(k5, (cout,), jnp.float32, 0.9, 1.1),
    }


def init_params(key, embed_size):
    keys = iter(jax.random.split(key, 64))
    params = {"conv1": _conv_bn_params(next(keys), 7, 7, 3, 64), "layers": []}
    in_ch = 64
    for width, nblocks in ((64, 3), (128, 4), (256, 6), (512, 3)):
        out_ch = width * 4
        blocks = []
        for bi in range(nblocks):
            blocks.append({
                "conv1": _conv_bn_params(next(keys), 1, 1, in_ch, width),
                "conv2": _conv_bn_params(next(keys), 3, 3, width, width),
                "conv3": _conv_bn_params(next(keys), 1, 1, width, out_ch),
                "down": (_conv_bn_params(next(keys), 1, 1, in_ch, out_ch)
                         if bi == 0 else None),
            })
            in_ch = out_ch
        params["layers"].append(blocks)
    k = 1.0 / np.sqrt(in_ch)
    params["fc_w"] = jax.random.uniform(next(keys), (embed_size, in_ch),
                                        jnp.float32, -k, k)       # (out, in)
    params["fc_b"] = jax.random.uniform(next(keys), (embed_size,),
                                        jnp.float32, -k, k)
    return params


def _fold_conv_bn(p, cin_store, compute_dtype=jnp.bfloat16, eps=1e-5):
    """Fold eval-BN; pad K per-tap to cin_store and N to a 128 multiple."""
    cout, cin, kh, kw = p["w"].shape
    cout_p = _cpad(cout)
    w = jnp.transpose(p["w"], (2, 3, 1, 0)).reshape(kh * kw, cin, cout)
    w = jnp.pad(w, ((0, 0), (0, cin_store - cin), (0, cout_p - cout)))
    scale = p["gamma"] / jnp.sqrt(p["var"] + eps)
    shift = p["beta"] - p["mean"] * scale
    scale = jnp.pad(scale, (0, cout_p - cout))
    shift = jnp.pad(shift, (0, cout_p - cout))
    return {"w": w.reshape(kh * kw * cin_store, cout_p).astype(compute_dtype),
            "scale": scale.reshape(1, cout_p).astype(jnp.float32),
            "shift": shift.reshape(1, cout_p).astype(jnp.float32)}


def preprocess_params(params, compute_dtype=jnp.bfloat16):
    """One-time weight prep: reshape, fold BN, persistent channel pad, bf16."""
    pp = {"conv1": _fold_conv_bn(params["conv1"], cin_store=3,
                                 compute_dtype=compute_dtype),
          "layers": []}

    def fold(p):
        cin = p["w"].shape[1]
        return _fold_conv_bn(p, cin_store=_cpad(cin),
                             compute_dtype=compute_dtype)

    for layer in params["layers"]:
        blocks = []
        for blk in layer:
            blocks.append({
                "conv1": fold(blk["conv1"]),
                "conv2": fold(blk["conv2"]),
                "conv3": fold(blk["conv3"]),
                "down": fold(blk["down"]) if blk["down"] is not None else None,
            })
        pp["layers"].append(blocks)

    embed = params["fc_w"].shape[0]
    n_p = _cpad(embed)
    fc_w = jnp.pad(jnp.transpose(params["fc_w"]), ((0, 0), (0, n_p - embed)))
    pp["fc"] = {
        "w": fc_w.astype(compute_dtype),
        "scale": jnp.pad(jnp.ones((embed,), jnp.float32),
                         (0, n_p - embed)).reshape(1, n_p),
        "shift": jnp.pad(params["fc_b"].astype(jnp.float32),
                         (0, n_p - embed)).reshape(1, n_p),
    }
    return pp


# ----------------------------------------------------------------------------
# Pure-JAX reference (XLA convs; same bf16 operand / f32 accumulation / bf16
# inter-layer storage policy as the Pallas path)
# ----------------------------------------------------------------------------
def _ref_forward(params, images, compute_dtype=jnp.bfloat16, eps=1e-5):
    def conv_bn(x, p, stride, pad, relu, residual=None):
        w = jnp.transpose(p["w"], (2, 3, 1, 0)).astype(compute_dtype)  # HWIO
        y = jax.lax.conv_general_dilated(
            x.astype(compute_dtype), w, (stride, stride),
            ((pad, pad), (pad, pad)),
            dimension_numbers=("NHWC", "HWIO", "NHWC"),
            preferred_element_type=jnp.float32)
        scale = p["gamma"] / jnp.sqrt(p["var"] + eps)
        shift = p["beta"] - p["mean"] * scale
        y = y * scale + shift
        if residual is not None:
            y = y + residual.astype(jnp.float32)
        if relu:
            y = jnp.maximum(y, 0.0)
        return y.astype(compute_dtype)

    x = jnp.transpose(images, (0, 2, 3, 1)).astype(compute_dtype)
    x = conv_bn(x, params["conv1"], 2, 3, True)
    x = jax.lax.reduce_window(x.astype(jnp.float32), -jnp.inf, jax.lax.max,
                              (1, 3, 3, 1), (1, 2, 2, 1),
                              ((0, 0), (1, 1), (1, 1), (0, 0))
                              ).astype(compute_dtype)
    for layer, s in zip(params["layers"], (1, 2, 2, 2)):
        for bi, blk in enumerate(layer):
            stride = s if bi == 0 else 1
            identity = x
            out = conv_bn(x, blk["conv1"], 1, 0, True)
            out = conv_bn(out, blk["conv2"], stride, 1, True)
            if blk["down"] is not None:
                identity = conv_bn(x, blk["down"], stride, 0, False)
            x = conv_bn(out, blk["conv3"], 1, 0, True, residual=identity)
    feats = jnp.mean(x.astype(jnp.float32), axis=(1, 2))
    return jnp.dot(feats.astype(compute_dtype),
                   jnp.transpose(params["fc_w"]).astype(compute_dtype),
                   preferred_element_type=jnp.float32) + params["fc_b"]


# ----------------------------------------------------------------------------
# Demo / correctness checks
# ----------------------------------------------------------------------------
if __name__ == "__main__":
    EMBED = 256
    B, H, W = 2, 64, 64

    # --- Unit test 1: fused matmul kernel (single-K path, residual + relu) ---
    ku = jax.random.split(jax.random.PRNGKey(1), 8)
    xt = jax.random.normal(ku[0], (160, 576), jnp.float32).astype(jnp.bfloat16)
    wt = (jax.random.normal(ku[1], (576, 384), jnp.float32) * 0.05
          ).astype(jnp.bfloat16)
    sc = jax.random.uniform(ku[2], (1, 384), jnp.float32, 0.5, 1.5)
    sh = jax.random.normal(ku[3], (1, 384), jnp.float32) * 0.1
    rs = jax.random.normal(ku[4], (160, 384), jnp.float32).astype(jnp.bfloat16)
    got = matmul_bn_act(xt, wt, sc, sh, residual=rs, relu=True)
    want = jnp.maximum(
        jnp.dot(xt, wt, preferred_element_type=jnp.float32) * sc + sh
        + rs.astype(jnp.float32), 0.0)
    np.testing.assert_allclose(np.asarray(got, np.float32), np.asarray(want),
                               rtol=2e-2, atol=2e-2)

    # --- Unit test 2: fused matmul kernel (multi-K path, K=4608) ------------
    xt2 = jax.random.normal(ku[5], (64, 4608), jnp.float32).astype(jnp.bfloat16)
    wt2 = (jax.random.normal(ku[6], (4608, 256), jnp.float32) * 0.02
           ).astype(jnp.bfloat16)
    got2 = matmul_bn_act(xt2, wt2, jnp.ones((1, 256), jnp.float32),
                         jnp.zeros((1, 256), jnp.float32), relu=False)
    want2 = jnp.dot(xt2, wt2, preferred_element_type=jnp.float32)
    np.testing.assert_allclose(np.asarray(got2, np.float32), np.asarray(want2),
                               rtol=2e-2, atol=2e-2)

    # --- Unit test 3: maxpool kernel (exact) ---------------------------------
    xp = jax.random.normal(ku[7], (2, 16, 16, 128), jnp.float32
                           ).astype(jnp.bfloat16)
    got3 = maxpool_3x3_s2(xp)
    want3 = jax.lax.reduce_window(xp.astype(jnp.float32), -jnp.inf, jax.lax.max,
                                  (1, 3, 3, 1), (1, 2, 2, 1),
                                  ((0, 0), (1, 1), (1, 1), (0, 0)))
    np.testing.assert_allclose(np.asarray(got3, np.float32), np.asarray(want3),
                               rtol=0, atol=0)

    # --- Unit test 4: global average pool kernel -----------------------------
    xa = jax.random.normal(jax.random.PRNGKey(2), (2, 6, 6, 256), jnp.float32
                           ).astype(jnp.bfloat16)
    got4 = global_avgpool(xa)
    want4 = jnp.mean(xa.astype(jnp.float32), axis=(1, 2))
    np.testing.assert_allclose(np.asarray(got4), np.asarray(want4),
                               rtol=1e-4, atol=1e-4)

    # --- End-to-end forward vs XLA reference ---------------------------------
    kp, kx = jax.random.split(jax.random.PRNGKey(0))
    params = init_params(kp, EMBED)
    images = jax.random.normal(kx, (B, 3, H, W), jnp.float32)

    pparams = preprocess_params(params)          # one-time weight preprocessing
    fwd = jax.jit(functools.partial(cnn_encoder_forward, embed_size=EMBED))
    feats = fwd(pparams, images)
    jax.block_until_ready(feats)
    assert feats.shape == (B, EMBED)

    ref = jax.jit(_ref_forward)(params, images)
    jax.block_until_ready(ref)

    # 53 bf16 conv layers on random (untrained) weights chaotically amplify
    # benign accumulation-order differences, so element-wise rtol on near-zero
    # outputs is not meaningful; the per-kernel unit tests above are tight, and
    # here we require the end-to-end error to be small vs the output scale
    # (a plumbing bug -- wrong pad/stride/residual -- would be O(30-100%)).
    f = np.asarray(feats, np.float32)
    r = np.asarray(ref, np.float32)
    scaled_err = np.max(np.abs(f - r)) / max(np.max(np.abs(r)), 1e-6)
    assert scaled_err < 5e-2, f"end-to-end mismatch: scaled max err {scaled_err:.4f}"

    print("KERNEL_OK")
</pallas_src>

<mosaic_0001>
module attributes {stable_mosaic.version = 11 : i64} {
  func.func @_matmul_fused_kernel(%arg0: i32, %arg1: i32, %arg2: memref<160x576xbf16, #tpu.memory_space<vmem>>, %arg3: memref<576x128xbf16, #tpu.memory_space<vmem>>, %arg4: memref<1x128xf32, #tpu.memory_space<vmem>>, %arg5: memref<1x128xf32, #tpu.memory_space<vmem>>, %arg6: memref<160x128xbf16, #tpu.memory_space<vmem>>, %arg7: memref<160x128xbf16, #tpu.memory_space<vmem>>) attributes {dimension_semantics = [#tpu.dimension_semantics<parallel>, #tpu.dimension_semantics<parallel>], iteration_bounds = array<i64: 1, 3>, scalar_prefetch = 0 : i64, scratch_operands = 0 : i64, tpu.core_type = #tpu.core_type<tc>, window_params = [{transform_indices = @transform_0, window_bounds = array<i64: 160, 576>}, {transform_indices = @transform_1, window_bounds = array<i64: 576, 128>}, {transform_indices = @transform_2, window_bounds = array<i64: 1, 128>}, {transform_indices = @transform_3, window_bounds = array<i64: 1, 128>}, {transform_indices = @transform_4, window_bounds = array<i64: 160, 128>}, {transform_indices = @transform_5, window_bounds = array<i64: 160, 128>}]} {
    %c0 = arith.constant 0 : index
    %c0_0 = arith.constant 0 : index
    %0 = vector.load %arg2[%c0, %c0_0] : memref<160x576xbf16, #tpu.memory_space<vmem>>, vector<160x576xbf16>
    %c0_1 = arith.constant 0 : index
    %c0_2 = arith.constant 0 : index
    %1 = vector.load %arg3[%c0_1, %c0_2] : memref<576x128xbf16, #tpu.memory_space<vmem>>, vector<576x128xbf16>
    %cst = arith.constant dense<0.000000e+00> : vector<160x128xf32>
    %2 = tpu.matmul %0, %1, %cst {dimension_numbers = #tpu.dot_dimension_numbers<[1], [0], [0], [1], [0, 0, 1, 1], [], []>} : vector<160x576xbf16>, vector<576x128xbf16>, vector<160x128xf32> -> vector<160x128xf32>
    %c0_3 = arith.constant 0 : index
    %c0_4 = arith.constant 0 : index
    %3 = vector.load %arg4[%c0_3, %c0_4] : memref<1x128xf32, #tpu.memory_space<vmem>>, vector<1x128xf32>
    %4 = vector.broadcast %3 : vector<1x128xf32> to vector<160x128xf32>
    %5 = arith.mulf %2, %4 : vector<160x128xf32>
    %c0_5 = arith.constant 0 : index
    %c0_6 = arith.constant 0 : index
    %6 = vector.load %arg5[%c0_5, %c0_6] : memref<1x128xf32, #tpu.memory_space<vmem>>, vector<1x128xf32>
    %7 = vector.broadcast %6 : vector<1x128xf32> to vector<160x128xf32>
    %8 = arith.addf %5, %7 : vector<160x128xf32>
    %c0_7 = arith.constant 0 : index
    %c0_8 = arith.constant 0 : index
    %9 = vector.load %arg6[%c0_7, %c0_8] : memref<160x128xbf16, #tpu.memory_space<vmem>>, vector<160x128xbf16>
    %10 = arith.extf %9 : vector<160x128xbf16> to vector<160x128xf32>
    %11 = arith.addf %8, %10 : vector<160x128xf32>
    %cst_9 = arith.constant 0.000000e+00 : f32
    %12 = vector.broadcast %cst_9 : f32 to vector<160x128xf32>
    %13 = arith.maximumf %11, %12 : vector<160x128xf32>
    %14 = arith.truncf %13 : vector<160x128xf32> to vector<160x128xbf16>
    %c0_10 = arith.constant 0 : index
    %c0_11 = arith.constant 0 : index
    %15 = vector.load %arg7[%c0_10, %c0_11] : memref<160x128xbf16, #tpu.memory_space<vmem>>, vector<160x128xbf16>
    tpu.vector_store %arg7[%c0_10, %c0_11], %14 {strides = array<i32>} : memref<160x128xbf16, #tpu.memory_space<vmem>>, vector<160x128xbf16>,
    return
  }
  func.func @transform_0(%arg0: i32, %arg1: i32) -> (i32, i32) {
    %c0_i32 = arith.constant 0 : i32
    %c0_i32_0 = arith.constant 0 : i32
    return %arg0, %c0_i32 : i32, i32
  }
  func.func @transform_1(%arg0: i32, %arg1: i32) -> (i32, i32) {
    %c0_i32 = arith.constant 0 : i32
    %c0_i32_0 = arith.constant 0 : i32
    return %c0_i32, %arg1 : i32, i32
  }
  func.func @transform_2(%arg0: i32, %arg1: i32) -> (i32, i32) {
    %c0_i32 = arith.constant 0 : i32
    %c0_i32_0 = arith.constant 0 : i32
    return %c0_i32, %arg1 : i32, i32
  }
  func.func @transform_3(%arg0: i32, %arg1: i32) -> (i32, i32) {
    %c0_i32 = arith.constant 0 : i32
    %c0_i32_0 = arith.constant 0 : i32
    return %c0_i32, %arg1 : i32, i32
  }
  func.func @transform_4(%arg0: i32, %arg1: i32) -> (i32, i32) {
    %c0_i32 = arith.constant 0 : i32
    return %arg0, %arg1 : i32, i32
  }
  func.func @transform_5(%arg0: i32, %arg1: i32) -> (i32, i32) {
    %c0_i32 = arith.constant 0 : i32
    return %arg0, %arg1 : i32, i32
  }
}

</mosaic_0001>

<bundles_post_ra>
// kernel: tpu_custom_call.1
= control target key start
LH: loop header
LB: loop body
LE: loop exit
PB: predicated region body
PF: predicated region fallthrough
CT: control target
= control target key end

     0   :  { %s3113_s0 = inlined_call_operand.hbm [shape: bf16[160,576], index: 0, kind: input, shape index: {}]   ;;  %s3114_s1 = inlined_call_operand.hbm [shape: bf16[576,384], index: 1, kind: input, shape index: {}]   ;;  %s3115_s2 = inlined_call_operand.vmem [shape: f32[1,384], index: 2, kind: input, shape index: {}]   ;;  %s3116_s3 = inlined_call_operand.vmem [shape: f32[1,384], index: 3, kind: input, shape index: {}]   ;;  %s3117_s4 = inlined_call_operand.hbm [shape: bf16[160,384], index: 4, kind: input, shape index: {}]   ;;  %s3118_s5 = inlined_call_operand.hbm [shape: bf16[160,384], index: 5, kind: output, shape index: {}]  }
   0x1   :  { %3126 = sst [smem:[#allocation12_spill]] %s3114_s1 }
   0x2   :  { %10 = vsyncpa [#allocation3], 0 }
   0x3   :  { %11 = vsyncpa [#allocation6], 0 }
   0x4   :  { %13 = vsyncpa [#allocation6 + $0x1], 0 }
   0x5   :  { %14 = vsyncpa [#allocation4], 0 }
   0x6   :  { %16 = vsyncpa [#allocation4 + $0x1], 0  ;;  %s2582_s18 = smov 0   ;;  %s2584_s19 = smov 0  }
   0x7   :  { %s2586_s20 = smov 0   ;;  %s2588_s21 = smov 0  }
   0x8   :  { %s2590_s22 = smov 0   ;;  %s2592_s23 = smov 0  }
   0x9 LB: > { %s31_s24 = sadd.s32 1, %s2534_s22  ;;  %s67_s25 = sadd.s32 1, %s2526_s20  ;;  %s2538_s23 = sphi %s2592_s23, %s22_s23   ;;  %s2534_s22 = sphi %s2590_s22, %s3150_s22   ;;  %s2530_s21 = sphi %s2588_s21, %s3149_s21   ;;  %s2526_s20 = sphi %s2586_s20, %s3148_s20   ;;  %s2522_s19 = sphi %s2584_s19, %s3147_s19   ;;  %s2518_s18 = sphi %s2582_s18, %s3146_s18  }
   0xa   : > { %p32_p0 = scmp.ge.s32.totalorder %s31_s24, 3  ;;  %p74_p1 = scmp.ne.s32.totalorder %s2526_s20, %s2522_s19 }
   0xb   : > { %p75_p2 = scmp.eq.s32.totalorder %s2538_s23, 0  ;;  %p2198_p4 = scmp.lt.s32.totalorder %s2538_s23, 3 }
   0xc   : > { %s3152_s24 = smov (%p32_p0, %s31_s24), 0  ;;  %s229_s27 = sand.u32 1, %s2538_s23  }
   0xd   : > { %p76_p3 = por %p75_p2, %p74_p1  ;;  %s64_s26 = ssub.s32 %s2534_s22, %s3152_s24 }
   0xe   : > { %p65_p5 = scmp.eq.s32.totalorder %s64_s26, 0  ;;  %s231_s28 = sand.u32 1, %s2526_s20  }
   0xf   : > { %s1713_s29 = sshll.u32 %s2534_s22, 6  ;;  %s2168_s6 = smul.u32 288, %s231_s28 }
  0x10   : > { %s2629_s30 = scalar_select %p65_p5, %s2526_s20, %s67_s25  }
  0x11   : > { %s3127_s1 = sld [smem:[#allocation12_spill]]  ;;  %p2640_p6 = pnand %p2198_p4, %p76_p3 }
  0x12   : > { %s233_s11 = scalar_lea.vmem [#allocation5], %s2168_s6  ;;  %s2646_s13 = scalar_lea.sflag [#allocation6], %s229_s27 }
  0x13   : > { %s239_s12 = sshll.u32 %s233_s11, 4  ;;  %p2366_p8 = pneg %p2640_p6  ;;  %s2644_s12 = int_to_ptr.vmem [resolvable:$true] %s239_s12 }
  0x17   : > { %s2638_s9 = scalar_lea.hbm %s3127_s1, %s1713_s29  ;;  %s2369_s17 = scalar_lea.hbm %s3127_s1, 13824 }
  0x18   : > { %s2364_s14 = scalar_lea.hbm %s2638_s9, 4608  ;;  %p2370_p11 = scmp.lt.u32.totalorder %s2638_s9, %s3127_s1 }
  0x19   : > { %p2365_p7 = scmp.ne.s32.totalorder %s2638_s9, %s2364_s14  ;;  %p2371_p12 = scmp.lt.u32.totalorder %s2369_s17, %s2364_s14 }
  0x1a   : > { %p2373_p0 = scmp.lt.u32.totalorder %s2364_s14, %s2638_s9 }
  0x1b   : > { %p2367_p9 = pnand %p2366_p8, %p2365_p7  ;;  %p2372_p13 = por %p2371_p12, %p2370_p11 }
  0x1d   : > { %p2368_p10 = pneg %p2367_p9  ;;  %p2374_p2 = por %p2373_p0, %p2372_p13 }
  0x1f   : > { %p2375_p3 = pnand %p2374_p2, %p2368_p10 }
  0x21   : > { %2378 = shalt.err (!%p2375_p3)
}
  0x22   : > { %s2379_s27 = scalar_lea.vmem %s2644_s12, 4608  ;;  %s2540_s6 = smov [#allocation5]  }
  0x23   : > { %p2380_p4 = scmp.ne.s32.totalorder %s2644_s12, %s2379_s27  ;;  %s2384_s7 = sshll.u32 %s2540_s6, 4  ;;  %s2385_s7 = int_to_ptr.vmem [resolvable:$false] %s2384_s7 }
  0x24   : > { %s2386_s8 = scalar_lea.vmem %s2385_s7, 9216  ;;  %p2387_p9 = scmp.lt.s32.totalorder %s2644_s12, %s2385_s7 }
  0x25   : > { %p2382_p5 = pnand %p2380_p4, %p2366_p8  ;;  %p2388_p11 = scmp.lt.s32.totalorder %s2386_s8, %s2379_s27 }
  0x27   : > { %p2383_p7 = pneg %p2382_p5  ;;  %p2389_p12 = por %p2388_p11, %p2387_p9 }
  0x29   : > { %p2390_p13 = pnand %p2389_p12, %p2383_p7 }
  0x2b   : > { %2393 = shalt.err (!%p2390_p13)
}
  0x2c   : > { %s3119_s11 = smov 192   ;;  %s3120_s14 = smov 64  }
  0x2d   : > { %s3121_s15 = smov 4   ;;  %s2169_s16 = smul.u32 80, %s231_s28 }
  0x2e   : > { %2189 = dma.hbm_to_vmem [thread:$0]  (!%p2640_p6), %s2638_s9, 4608, %s2644_s12, %s2646_s13, %s3119_s11, %s3120_s14, %s3121_s15  }
  0x2f   : > { %s2684_s26 = scalar_lea.hbm %s3117_s4, %s1713_s29  ;;  %s2687_s27 = sadd.s32 4294967295, %s2538_s23  }
  0x30   : > { %s1709_s6 = sadd.s32 4294967294, %s2538_s23   ;;  %p80_p10 = scmp.ne.s32.totalorder %s2522_s19, %s2518_s18 }
  0x31   : > { %p3122_p0 = scmp.eq.s32.totalorder %s2687_s27, 0  ;;  %p186_p2 = scmp.eq.s32.totalorder %s2687_s27, 2 }
  0x32   : > { %p192_p3 = scmp.eq.s32.totalorder %s1709_s6, 2  ;;  %p1710_p5 = scmp.ge.s32.totalorder %s2538_s23, 1 }
  0x33   : > { %p2696_p4 = por %p3122_p0, %p80_p10  ;;  %p2704_p7 = por %p186_p2, %p74_p1 }
  0x34   : > { %p2708_p9 = por %p192_p3, %p80_p10  ;;  %p199_p11 = scmp.lt.s32.totalorder %s2538_s23, 4 }
  0x35   : > { %s3129_s28 = scalar_select %p2696_p4, 1, 0 }
  0x36   : > { %s3130_s29 = scalar_select %p2704_p7, 1, 0 }
  0x37   : > { %s3131_s9 = scalar_select %p2708_p9, 1, 0 }
  0x38   : > { %s265_s12 = scalar_lea.vmem [#allocation7], %s2169_s16  ;;  %p2713_p12 = pnand %p1710_p5, %p199_p11 }
  0x39   : > { %s274_s7 = sshll.u32 %s265_s12, 4  ;;  %s2544_s17 = smov [#allocation2]   ;;  %s2721_s7 = int_to_ptr.vmem [resolvable:$true] %s274_s7 }
  0x3a   : > { %s3132_s8 = scalar_select %p2713_p12, 1, 0 }
  0x3b   : > { %s215_s25 = sshll.u32 %s2544_s17, 4  ;;  %s2394_s6 = scalar_lea.hbm %s2684_s26, 1280  ;;  %s2717_s25 = int_to_ptr.vmem [resolvable:$true] %s215_s25 }
  0x3c   : > { %p2395_p13 = scmp.ne.s32.totalorder %s2684_s26, %s2394_s6  ;;  %s2399_s11 = scalar_lea.hbm %s3117_s4, 3840 }
  0x3d   : > { %p2400_p3 = scmp.lt.u32.totalorder %s2684_s26, %s3117_s4  ;;  %p2401_p5 = scmp.lt.u32.totalorder %s2399_s11, %s2394_s6 }
  0x3e   : > { %p2397_p10 = pnand %p2395_p13, %p2366_p8  ;;  %p2403_p0 = scmp.lt.u32.totalorder %s2394_s6, %s2684_s26 }
  0x3f   : > { %p2402_p11 = por %p2401_p5, %p2400_p3 }
  0x40   : > { %p2398_p2 = pneg %p2397_p10 }
  0x41   : > { %p2404_p1 = por %p2403_p0, %p2402_p11 }
  0x43   : > { %p2405_p9 = pnand %p2404_p1, %p2398_p2 }
  0x45   : > { %2408 = shalt.err (!%p2405_p9)
}
  0x46   : > { %s2409_s17 = scalar_lea.vmem %s2721_s7, 1280  ;;  %s2545_s16 = smov [#allocation7]  }
  0x47   : > { %p2410_p13 = scmp.ne.s32.totalorder %s2721_s7, %s2409_s17  ;;  %s2414_s12 = sshll.u32 %s2545_s16, 4  ;;  %s2415_s12 = int_to_ptr.vmem [resolvable:$false] %s2414_s12 }
  0x48   : > { %s2416_s14 = scalar_lea.vmem %s2415_s12, 2560  ;;  %p2417_p4 = scmp.lt.s32.totalorder %s2721_s7, %s2415_s12 }
  0x49   : > { %p2412_p10 = pnand %p2410_p13, %p2366_p8  ;;  %p2418_p3 = scmp.lt.s32.totalorder %s2416_s14, %s2409_s17 }
  0x4b   : > { %p2413_p7 = pneg %p2412_p10  ;;  %p2419_p5 = por %p2418_p3, %p2417_p4 }
  0x4d   : > { %p2420_p0 = pnand %p2419_p5, %p2413_p7 }
  0x4f   : > { %2423 = shalt.err (!%p2420_p0)
}
  0x50   : > { %s3133_s11 = smov 4   ;;  %s3134_s15 = smov 64  }
  0x51   : > { %s3135_s6 = smov 192   ;;  %p3136_p8 = scmp.eq.s32.totalorder %s2687_s27, 0 }
  0x52   : > { %2192 = dma.hbm_to_vmem [thread:$0]  (!%p2640_p6), %s2684_s26, 1280, %s2721_s7, %s2646_s13, %s3135_s6, %s3134_s15, %s3133_s11  }
  0x53   : > { %p3137_p9 = pneg %p2713_p12  ;;  %s2424_s10 = scalar_lea.hbm %s3113_s0, 6400 }
  0x54   : > { %p2425_p4 = scmp.ne.s32.totalorder %s3113_s0, %s2424_s10  ;;  %p2431_p11 = scmp.lt.u32.totalorder %s2424_s10, %s3113_s0 }
  0x55   : > { %p2755_p1 = pnand %p3137_p9, %p3136_p8 }
  0x57   : > { %p2426_p7 = pneg %p2755_p1 }
  0x59   : > { %p2427_p2 = pnand %p2426_p7, %p2425_p4 }
  0x5b   : > { %p2428_p6 = pneg %p2427_p2 }
  0x5d   : > { %p2433_p13 = pnand %p2431_p11, %p2428_p6 }
  0x5f   : > { %2436 = shalt.err (!%p2433_p13)
}
  0x60   : > { %s2437_s7 = scalar_lea.vmem %s2717_s25, 6400  ;;  %p2445_p0 = scmp.lt.s32.totalorder %s2717_s25, %s2717_s25 }
  0x61   : > { %p2438_p10 = scmp.ne.s32.totalorder %s2717_s25, %s2437_s7  ;;  %p2446_p8 = scmp.lt.s32.totalorder %s2437_s7, %s2437_s7 }
  0x63   : > { %p2440_p3 = pnand %p2438_p10, %p2426_p7  ;;  %p2447_p9 = por %p2446_p8, %p2445_p0 }
  0x65   : > { %p2441_p5 = pneg %p2440_p3 }
  0x67   : > { %p2448_p12 = pnand %p2447_p9, %p2441_p5 }
  0x69   : > { %2451 = shalt.err (!%p2448_p12)
}
  0x6a   : > { %s2546_s1 = smov 320   ;;  %s2547_s11 = smov 20  }
  0x6b   : > { %2185 = dma.hbm_to_vmem [thread:$0]  (!%p2755_p1), %s3113_s0, 6400, %s2717_s25, [#allocation3], %s2546_s1, %s2546_s1, %s2547_s11  }
  0x6c   : > { %p3139_p4 = scmp.ne.s32.totalorder %s3132_s8, 0 }
  0x6d   : > { %p3140_p7 = scmp.eq.s32.totalorder (!%p3139_p4), %s2687_s27, 0 }
  0x6e   : > { %286 = sbr.rel (%p3139_p4) target bundleno = 499 (0x1f3), region = 40 }
  0x75   : > { %2505 = dma.done.wait (%p3140_p7), [#allocation3], 6400   ;;  %p3141_p2 = pmov %p3140_p7 }
  0x76   : > { %s292_s17 = sand.u32 1, %s2687_s27   ;;  %s2788_s12 = sand.u32 1, %s2522_s19  }
  0x77   : > { %2507 = vsyncadd (%p3141_p2), [#allocation3], 4294960896  ;;  %s2170_s16 = smul.u32 288, %s2788_s12  ;;  %s293_s10 = scalar_lea.sflag [#allocation6], %s292_s17 }
  0x78   : > { %p3142_p12 = scmp.ne.s32.totalorder %s3129_s28, 0 }
  0x79   : > { %s2791_s14 = scalar_lea.vmem [#allocation5], %s2170_s16 }
  0x7a   : > { %2509 = dma.done.wait (%p3142_p12), %s293_s10, 5888  }
  0x7b   : > { %2511 = vsyncadd (%p3142_p12), %s293_s10, 4294961408  ;;  %v2258_v0 = vld [vmem:[%s2791_s14 + $0x40] sm:$0xff]   ;;  %v2262_v4 = vld [vmem:[%s2791_s14 + $0x48] sm:$0xff]   ;;  %vm951_vm0 = vcmask 523264   ;;  %s2171_s27 = smul.u32 80, %s2788_s12  ;;  %p344_p1 = scmp.lt.s32.totalorder %s2530_s21, 2 }
  0x7c   : > { %v2259_v1 = vld [vmem:[%s2791_s14 + $0xc0] sm:$0xff]   ;;  %1966 = vmatprep.subr.bf16.mxu0 %v2258_v0  ;;  %v2263_v5 = vld [vmem:[%s2791_s14 + $0xc8] sm:$0xff]   ;;  %v2266_v8 = vld [vmem:[%s2791_s14 + $0x50] sm:$0xff]   ;;  %s1835_s17 = sshll.u32 %s2530_s21, 6  ;;  %p3144_p11 = scmp.ne.s32.totalorder %s3130_s29, 0 }
  0x7d   : > { %v2260_v2 = vld [vmem:[%s2791_s14] sm:$0xff]   ;;  %2042 = vmatprep.subr.bf16.mxu1 %v2259_v1  ;;  %v2264_v6 = vld [vmem:[%s2791_s14 + $0x8] sm:$0xff]   ;;  %v2267_v9 = vld [vmem:[%s2791_s14 + $0xd0] sm:$0xff]   ;;  %s2882_s28 = scalar_select %p344_p1, %s2530_s21, 2 }
  0x7e   : > { %v2261_v3 = vld [vmem:[%s2791_s14 + $0x80] sm:$0xff]   ;;  %1967 = vmatpush3.bf16.msra.mxu0 %v2260_v2  ;;  %v2265_v7 = vld [vmem:[%s2791_s14 + $0x88] sm:$0xff]   ;;  %v2268_v10 = vld [vmem:[%s2791_s14 + $0x10] sm:$0xff]   ;;  %s2886_s8 = scalar_lea.vmem [#allocation7], %s2171_s27  ;;  %s2993_s15 = scalar_lea.vmem [#allocation8], %s2171_s27 }
  0x7f   : > { %2043 = vmatpush3.bf16.msra.mxu1 %v2261_v3  ;;  %1968 = vmatprep.subr.bf16.mxu0 %v2262_v4  ;;  %v2269_v11 = vld [vmem:[%s2791_s14 + $0x90] sm:$0xff]   ;;  %v2270_v12 = vld [vmem:[%s2791_s14 + $0x58] sm:$0xff]   ;;  %v2274_v16 = vld [vmem:[%s2791_s14 + $0x60] sm:$0xff]   ;;  %s346_s26 = scalar_lea.vmem %s3115_s2, %s2882_s28  ;;  %s349_s11 = scalar_lea.vmem %s3116_s3, %s2882_s28 }
  0x80   : > { %2044 = vmatprep.subr.bf16.mxu1 %v2263_v5  ;;  %v2271_v13 = vld [vmem:[%s2791_s14 + $0xd8] sm:$0xff]   ;;  %v2275_v17 = vld [vmem:[%s2791_s14 + $0xe0] sm:$0xff]   ;;  %v2278_v20 = vld [vmem:[%s2791_s14 + $0x68] sm:$0xff]   ;;  %s1571_s6 = sshll.u32 %s2993_s15, 4  ;;  %s1556_s27 = scalar_lea.sflag [#allocation4], %s2788_s12  ;;  %s3058_s6 = int_to_ptr.vmem [resolvable:$true] %s1571_s6 }
  0x81   : > { %v2272_v14 = vld [vmem:[%s2791_s14 + $0x18] sm:$0xff]   ;;  %v2276_v18 = vld [vmem:[%s2791_s14 + $0x20] sm:$0xff]   ;;  %v2279_v21 = vld [vmem:[%s2791_s14 + $0xe8] sm:$0xff]   ;;  %s2452_s21 = scalar_lea.vmem %s3058_s6, 1280  ;;  %s2548_s28 = smov [#allocation8]  }
  0x82   : > { %1969 = vmatpush3.bf16.msra.mxu0 %v2264_v6  ;;  %v2273_v15 = vld [vmem:[%s2791_s14 + $0x98] sm:$0xff]   ;;  %v2277_v19 = vld [vmem:[%s2791_s14 + $0xa0] sm:$0xff]   ;;  %v2280_v22 = vld [vmem:[%s2791_s14 + $0x28] sm:$0xff]   ;;  %p2453_p6 = scmp.ne.s32.totalorder %s3058_s6, %s2452_s21 }
  0x83   : > { %2045 = vmatpush3.bf16.msra.mxu1 %v2265_v7  ;;  %1970 = vmatprep.subr.bf16.mxu0 %v2266_v8  ;;  %v2281_v23 = vld [vmem:[%s2791_s14 + $0xa8] sm:$0xff]   ;;  %v2282_v24 = vld [vmem:[%s2791_s14 + $0x70] sm:$0xff]   ;;  %v2286_v28 = vld [vmem:[%s2791_s14 + $0x78] sm:$0xff]  }
  0x84   : > { %2046 = vmatprep.subr.bf16.mxu1 %v2267_v9  ;;  %v2283_v25 = vld [vmem:[%s2791_s14 + $0xf0] sm:$0xff]   ;;  %v2287_v29 = vld [vmem:[%s2791_s14 + $0xf8] sm:$0xff]   ;;  %v2296_v36 = vld [vmem:[%s2791_s14 + $0x100] sm:$0xff]   ;;  %p2454_p13 = pnand %p2453_p6, %p3144_p11 }
  0x85   : > { %v2284_v26 = vld [vmem:[%s2791_s14 + $0x30] sm:$0xff]   ;;  %v2288_v30 = vld [vmem:[%s2791_s14 + $0x38] sm:$0xff]   ;;  %v2309_v42 = vld [vmem:[%s2791_s14 + $0x108] sm:$0xff]  }
  0x86   : > { %1971 = vmatpush3.bf16.msra.mxu0 %v2268_v10  ;;  %v2285_v27 = vld [vmem:[%s2791_s14 + $0xb0] sm:$0xff]   ;;  %v2289_v31 = vld [vmem:[%s2791_s14 + $0xb8] sm:$0xff]   ;;  %v2305_v43 = vld [vmem:[#allocation2 + $0x5c] ss:$20 sps:$4 sm:$0xff]   ;;  %p2455_p10 = pneg %p2454_p13 }
  0x87   : > { %2047 = vmatpush3.bf16.msra.mxu1 %v2269_v11  ;;  %1972 = vmatprep.subr.bf16.mxu0 %v2270_v12  ;;  %v2290_v32 = vld [vmem:[#allocation2] ss:$20 sps:$4 sm:$0xff]   ;;  %v2292_v33 = vld [vmem:[#allocation2 + $0x4] ss:$20 sps:$4 sm:$0xff]   ;;  %v2293_v34 = vld [vmem:[#allocation2 + $0x8] ss:$20 sps:$4 sm:$0xff]  }
  0x88   : > { %2048 = vmatprep.subr.bf16.mxu1 %v2271_v13  ;;  %v2295_v35 = vld [vmem:[#allocation2 + $0xc] ss:$20 sps:$4 sm:$0xff]   ;;  %1014 = vmatprep.mubr.bf16.mxu0 %v2292_v33  ;;  %v2299_v38 = vld [vmem:[#allocation2 + $0x34] ss:$20 sps:$4 sm:$0xff]   ;;  %v2302_v40 = vld [vmem:[#allocation2 + $0x30] ss:$20 sps:$4 sm:$0xff]  }
  0x89   : > { %1127 = vmatprep.mubr.bf16.mxu1 %v2295_v35  ;;  %v2297_v37 = vld [vmem:[#allocation2 + $0x2c] ss:$20 sps:$4 sm:$0xff]   ;;  %v2301_v39 = vld [vmem:[#allocation2 + $0x28] ss:$20 sps:$4 sm:$0xff]   ;;  %v2307_v44 = vld [vmem:[#allocation2 + $0x50] ss:$20 sps:$4 sm:$0xff]  }
  0x8a   : > { %1973 = vmatpush3.bf16.msra.mxu0 %v2272_v14  ;;  %v2303_v41 = vld [vmem:[#allocation2 + $0x54] ss:$20 sps:$4 sm:$0xff]   ;;  %v2308_v45 = vld [vmem:[#allocation2 + $0x58] ss:$20 sps:$4 sm:$0xff]   ;;  %v2310_v46 = vld [vmem:[#allocation2 + $0x7c] ss:$20 sps:$4 sm:$0xff]  }
  0x8b   : > { %2049 = vmatpush3.bf16.msra.mxu1 %v2273_v15  ;;  %1974 = vmatprep.subr.bf16.mxu0 %v2274_v16  ;;  %v2312_v47 = vld [vmem:[#allocation2 + $0x84] ss:$20 sps:$4 sm:$0xff]   ;;  %v2315_v50 = vld [vmem:[#allocation2 + $0x80] ss:$20 sps:$4 sm:$0xff]   ;;  %v2341_v52 = vld [vmem:[%s2791_s14 + $0x118] sm:$0xff]  }
  0x8c   : > { %2050 = vmatprep.subr.bf16.mxu1 %v2275_v17  ;;  %v2328_v48 = vld [vmem:[%s2791_s14 + $0x110] sm:$0xff]   ;;  %v2314_v49 = vld [vmem:[#allocation2 + $0x78] ss:$20 sps:$4 sm:$0xff]   ;;  %v2321_v55 = vld [vmem:[#allocation2 + $0xa8] ss:$20 sps:$4 sm:$0xff]   ;;  %s3063_s14 = scalar_lea.hbm %s3118_s5, %s1835_s17 }
  0x8d   : > { %v2316_v51 = vld [vmem:[#allocation2 + $0xa4] ss:$20 sps:$4 sm:$0xff]   ;;  %v2318_v53 = vld [vmem:[#allocation2 + $0xac] ss:$20 sps:$4 sm:$0xff]   ;;  %v2324_v57 = vld [vmem:[#allocation2 + $0xd4] ss:$20 sps:$4 sm:$0xff]  }
  0x8e   : > { %1975 = vmatpush3.bf16.msra.mxu0 %v2276_v18  ;;  %v2320_v54 = vld [vmem:[#allocation2 + $0xa0] ss:$20 sps:$4 sm:$0xff]   ;;  %v2326_v58 = vld [vmem:[#allocation2 + $0xc8] ss:$20 sps:$4 sm:$0xff]   ;;  %v2327_v59 = vld [vmem:[#allocation2 + $0xd0] ss:$20 sps:$4 sm:$0xff]  }
  0x8f   : > { %2051 = vmatpush3.bf16.msra.mxu1 %v2277_v19  ;;  %1976 = vmatprep.subr.bf16.mxu0 %v2278_v20  ;;  %v2322_v56 = vld [vmem:[#allocation2 + $0xcc] ss:$20 sps:$4 sm:$0xff]   ;;  %v2329_v60 = vld [vmem:[#allocation2 + $0xf4] ss:$20 sps:$4 sm:$0xff]   ;;  %v2331_v61 = vld [vmem:[#allocation2 + $0xfc] ss:$20 sps:$4 sm:$0xff]  }
  0x90   : > { %2052 = vmatprep.subr.bf16.mxu1 %v2279_v21  ;;  %v2333_v62 = vld [vmem:[#allocation2 + $0xf0] ss:$20 sps:$4 sm:$0xff]   ;;  %v2334_v63 = vld [vmem:[#allocation2 + $0xf8] ss:$20 sps:$4 sm:$0xff]   ;;  %v2340_v3 = vld [vmem:[#allocation2 + $0x120] ss:$20 sps:$4 sm:$0xff]  }
  0x91   : > { %v2335_v0 = vld [vmem:[#allocation2 + $0x11c] ss:$20 sps:$4 sm:$0xff]   ;;  %v2337_v1 = vld [vmem:[#allocation2 + $0x124] ss:$20 sps:$4 sm:$0xff]   ;;  %v2344_v5 = vld [vmem:[#allocation2 + $0x14c] ss:$20 sps:$4 sm:$0xff]  }
  0x92   : > { %1977 = vmatpush3.bf16.msra.mxu0 %v2280_v22  ;;  %v2339_v2 = vld [vmem:[#allocation2 + $0x118] ss:$20 sps:$4 sm:$0xff]   ;;  %v2346_v6 = vld [vmem:[#allocation2 + $0x140] ss:$20 sps:$4 sm:$0xff]   ;;  %v2347_v7 = vld [vmem:[#allocation2 + $0x148] ss:$20 sps:$4 sm:$0xff]  }
  0x93   : > { %2053 = vmatpush3.bf16.msra.mxu1 %v2281_v23  ;;  %1978 = vmatprep.subr.bf16.mxu0 %v2282_v24  ;;  %v2342_v4 = vld [vmem:[#allocation2 + $0x144] ss:$20 sps:$4 sm:$0xff]   ;;  %v2348_v8 = vld [vmem:[#allocation2 + $0x16c] ss:$20 sps:$4 sm:$0xff]   ;;  %v2350_v9 = vld [vmem:[#allocation2 + $0x174] ss:$20 sps:$4 sm:$0xff]  }
  0x94   : > { %2054 = vmatprep.subr.bf16.mxu1 %v2283_v25  ;;  %v2352_v10 = vld [vmem:[#allocation2 + $0x168] ss:$20 sps:$4 sm:$0xff]   ;;  %v2353_v11 = vld [vmem:[#allocation2 + $0x170] ss:$20 sps:$4 sm:$0xff]   ;;  %v2355_v13 = vld [vmem:[#allocation2 + $0x100] ss:$20 sps:$4 sm:$0xff]  }
  0x95   : > { %v2354_v12 = vld [vmem:[#allocation2 + $0x10] ss:$20 sps:$4 sm:$0xff]   ;;  %v2356_v14 = vld [vmem:[#allocation2 + $0x38] ss:$20 sps:$4 sm:$0xff]   ;;  %v2357_v15 = vld [vmem:[#allocation2 + $0x128] ss:$20 sps:$4 sm:$0xff]  }
  0x96   : > { %1979 = vmatpush3.bf16.msra.mxu0 %v2284_v26  ;;  %v2358_v16 = vld [vmem:[#allocation2 + $0x60] ss:$20 sps:$4 sm:$0xff]   ;;  %v2359_v17 = vld [vmem:[#allocation2 + $0x150] ss:$20 sps:$4 sm:$0xff]   ;;  %v2360_v18 = vld [vmem:[#allocation2 + $0x88] ss:$20 sps:$4 sm:$0xff]  }
  0x97   : > { %2055 = vmatpush3.bf16.msra.mxu1 %v2285_v27  ;;  %1980 = vmatprep.subr.bf16.mxu0 %v2286_v28  ;;  %v2361_v19 = vld [vmem:[#allocation2 + $0x178] ss:$20 sps:$4 sm:$0xff]   ;;  %v2362_v20 = vld [vmem:[#allocation2 + $0xb0] ss:$20 sps:$4 sm:$0xff]  }
  0x98   : > { %2056 = vmatprep.subr.bf16.mxu1 %v2287_v29  ;;  %v2363_v21 = vld [vmem:[#allocation2 + $0xd8] ss:$20 sps:$4 sm:$0xff]  }
  0x9a   : > { %1981 = vmatpush3.bf16.msra.mxu0 %v2288_v30 }
  0x9b   : > { %2057 = vmatpush3.bf16.msra.mxu1 %v2289_v31  ;;  %2132 = vmatprep.subr.bf16.mxu0 %v2296_v36 }
  0x9c   : > { %2160 = vmatprep.subr.bf16.mxu1 %v2296_v36 }
  0x9d   : > { %1015 = vmatmul.mubr.bf16.vlgmr.msra.gmra.mrb[0].mxu0 %v2290_v32 }
  0x9e   : > { %1128 = vmatmul.mubr.bf16.vlgmr.msra.gmra.mrb[0].mxu1 %v2293_v34  ;;  %2133 = vmatpush3.bf16.msra.mxu0 %v2296_v36 }
  0x9f   : > { %1022 = vmatprep.mubr.bf16.mxu0 %v2297_v37  ;;  %1135 = vmatprep.mubr.bf16.mxu1 %v2299_v38 }
  0xa0   : > { %2164 = vmatpush3.bf16.msra.mxu1 %v2296_v36  ;;  %2134 = vmatprep.subr.bf16.mxu0 %v2309_v42 }
  0xa1   : > { %2161 = vmatprep.subr.bf16.mxu1 %v2309_v42 }
  0xa2   : > { %2135 = vmatpush3.bf16.msra.mxu0 %v2309_v42 }
  0xa3   : > { %2136 = vmatprep.subr.bf16.mxu0 %v2328_v48 }
  0xa4   : > { %2165 = vmatpush3.bf16.msra.mxu1 %v2309_v42 }
  0xa5   : > { %1023 = vmatmul.mubr.bf16.gmra.mrb[4].mxu0 %v2301_v39  ;;  %2162 = vmatprep.subr.bf16.mxu1 %v2328_v48 }
  0xa6   : > { %1136 = vmatmul.mubr.bf16.gmra.mrb[4].mxu1 %v2302_v40  ;;  %1030 = vmatprep.mubr.bf16.mxu0 %v2303_v41 }
  0xa7   : > { %1143 = vmatprep.mubr.bf16.mxu1 %v2305_v43  ;;  %2137 = vmatpush3.bf16.msra.mxu0 %v2328_v48 }
  0xa8   : > { %2166 = vmatpush3.bf16.msra.mxu1 %v2328_v48  ;;  %2138 = vmatprep.subr.bf16.mxu0 %v2341_v52 }
  0xa9   : > { %2163 = vmatprep.subr.bf16.mxu1 %v2341_v52 }
  0xab   : > { %2139 = vmatpush3.bf16.msra.mxu0 %v2341_v52 }
  0xac   : > { %2167 = vmatpush3.bf16.msra.mxu1 %v2341_v52 }
  0xad   : > { %1031 = vmatmul.mubr.bf16.gmra.mrb[8].mxu0 %v2307_v44 }
  0xae   : > { %1144 = vmatmul.mubr.bf16.gmra.mrb[8].mxu1 %v2308_v45  ;;  %1038 = vmatprep.mubr.bf16.mxu0 %v2310_v46 }
  0xaf   : > { %1151 = vmatprep.mubr.bf16.mxu1 %v2312_v47 }
  0xb5   : > { %1039 = vmatmul.mubr.bf16.gmra.mrb[12].mxu0 %v2314_v49 }
  0xb6   : > { %1152 = vmatmul.mubr.bf16.gmra.mrb[12].mxu1 %v2315_v50  ;;  %1046 = vmatprep.mubr.bf16.mxu0 %v2316_v51 }
  0xb7   : > { %1159 = vmatprep.mubr.bf16.mxu1 %v2318_v53 }
  0xbd   : > { %1047 = vmatmul.mubr.bf16.gmra.mrb[16].mxu0 %v2320_v54 }
  0xbe   : > { %1160 = vmatmul.mubr.bf16.gmra.mrb[16].mxu1 %v2321_v55  ;;  %1054 = vmatprep.mubr.bf16.mxu0 %v2322_v56 }
  0xbf   : > { %1167 = vmatprep.mubr.bf16.mxu1 %v2324_v57 }
  0xc5   : > { %1055 = vmatmul.mubr.bf16.gmra.mrb[20].mxu0 %v2326_v58 }
  0xc6   : > { %1168 = vmatmul.mubr.bf16.gmra.mrb[20].mxu1 %v2327_v59  ;;  %1062 = vmatprep.mubr.bf16.mxu0 %v2329_v60 }
  0xc7   : > { %1175 = vmatprep.mubr.bf16.mxu1 %v2331_v61 }
  0xcd   : > { %1063 = vmatmul.mubr.bf16.gmra.mrb[24].mxu0 %v2333_v62 }
  0xce   : > { %1176 = vmatmul.mubr.bf16.gmra.mrb[24].mxu1 %v2334_v63  ;;  %1070 = vmatprep.mubr.bf16.mxu0 %v2335_v0 }
  0xcf   : > { %1183 = vmatprep.mubr.bf16.mxu1 %v2337_v1 }
  0xd5   : > { %1071 = vmatmul.mubr.bf16.gmra.mrb[28].mxu0 %v2339_v2 }
  0xd6   : > { %1184 = vmatmul.mubr.bf16.gmra.mrb[28].mxu1 %v2340_v3  ;;  %1078 = vmatprep.mubr.bf16.mxu0 %v2342_v4 }
  0xd7   : > { %1191 = vmatprep.mubr.bf16.mxu1 %v2344_v5 }
  0xdd   : > { %1079 = vmatmul.mubr.bf16.gmra.mrb[32].mxu0 %v2346_v6 }
  0xde   : > { %1192 = vmatmul.mubr.bf16.gmra.mrb[32].mxu1 %v2347_v7  ;;  %1086 = vmatprep.mubr.bf16.mxu0 %v2348_v8 }
  0xdf   : > { %1199 = vmatprep.mubr.bf16.mxu1 %v2350_v9 }
  0xe5   : > { %1087 = vmatmul.mubr.bf16.gmra.mrb[36].mxu0 %v2352_v10 }
  0xe6   : > { %1200 = vmatmul.mubr.bf16.gmra.mrb[36].mxu1 %v2353_v11  ;;  %2140 = vmatprep.mubr.msk.bf16.mxu0 %vm951_vm0, %v2354_v12 }
  0xe7   : > { %2152 = vmatprep.mubr.msk.bf16.mxu1 %vm951_vm0, %v2355_v13 }
  0xed   : > { %2141 = vmatmul.mubr.msk.bf16.vlgmr.msra.gmra.mrb[40].mxu0 %vm951_vm0, %v2356_v14 }
  0xee   : > { %2153 = vmatmul.mubr.msk.bf16.vlgmr.msra.gmra.mrb[40].mxu1 %vm951_vm0, %v2357_v15  ;;  %2144 = vmatprep.mubr.msk.bf16.mxu0 %vm951_vm0, %v2358_v16 }
  0xef   : > { %2156 = vmatprep.mubr.msk.bf16.mxu1 %vm951_vm0, %v2359_v17 }
  0xf5   : > { %2145 = vmatmul.mubr.msk.bf16.gmra.mrb[44].mxu0 %vm951_vm0, %v2360_v18 }
  0xf6   : > { %2157 = vmatmul.mubr.msk.bf16.gmra.mrb[44].mxu1 %vm951_vm0, %v2361_v19  ;;  %2148 = vmatprep.mubr.msk.bf16.mxu0 %vm951_vm0, %v2362_v20 }
  0xfd   : > { %2149 = vmatmul.mubr.msk.bf16.gmra.mrb[48].mxu0 %vm951_vm0, %v2363_v21 }
 0x170   : > { %v1982_v22 = vpop.f32.mrb[0].mxu0 }
 0x171   : > { %v2058_v23 = vpop.f32.mrb[0].mxu1  ;;  %v1983_v24 = vpop.f32.mrb[1].mxu0 }
 0x172   : > { %v1984_v25 = vadd.f32 %v1983_v24, %v1982_v22  ;;  %v2059_v26 = vpop.f32.mrb[1].mxu1  ;;  %v1985_v27 = vpop.f32.mrb[2].mxu0 }
 0x173   : > { %v2060_v28 = vadd.f32 %v2059_v26, %v2058_v23  ;;  %v2061_v29 = vpop.f32.mrb[2].mxu1  ;;  %v1986_v30 = vpop.f32.mrb[3].mxu0 }
 0x174   : > { %v1987_v31 = vadd.f32 %v1986_v30, %v1985_v27  ;;  %v2062_v32 = vpop.f32.mrb[3].mxu1 }
 0x175   : > { %v2063_v33 = vadd.f32 %v2062_v32, %v2061_v29  ;;  %v2843_v34 = vadd.f32 %v2060_v28, %v1984_v25 }
 0x177   : > { %v2845_v35 = vadd.f32 %v2063_v33, %v1987_v31 }
 0x178   : > { %v1988_v36 = vpop.f32.mrb[4].mxu0 }
 0x179   : > { %v2064_v37 = vpop.f32.mrb[4].mxu1  ;;  %v1989_v38 = vpop.f32.mrb[5].mxu0 }
 0x17a   : > { %v1990_v39 = vadd.f32 %v1989_v38, %v1988_v36  ;;  %v2065_v40 = vpop.f32.mrb[5].mxu1  ;;  %v1991_v41 = vpop.f32.mrb[6].mxu0 }
 0x17b   : > { %v2066_v42 = vadd.f32 %v2065_v40, %v2064_v37  ;;  %v2067_v43 = vpop.f32.mrb[6].mxu1  ;;  %v1992_v44 = vpop.f32.mrb[7].mxu0 }
 0x17c   : > { %v1993_v45 = vadd.f32 %v1992_v44, %v1991_v41  ;;  %v2068_v46 = vpop.f32.mrb[7].mxu1 }
 0x17d   : > { %v2069_v47 = vadd.f32 %v2068_v46, %v2067_v43  ;;  %v2847_v48 = vadd.f32 %v2066_v42, %v1990_v39 }
 0x17f   : > { %v2849_v49 = vadd.f32 %v2069_v47, %v1993_v45 }
 0x180   : > { %v1994_v50 = vpop.f32.mrb[8].mxu0 }
 0x181   : > { %v2070_v51 = vpop.f32.mrb[8].mxu1  ;;  %v1995_v52 = vpop.f32.mrb[9].mxu0 }
 0x182   : > { %v1996_v53 = vadd.f32 %v1995_v52, %v1994_v50  ;;  %v2071_v54 = vpop.f32.mrb[9].mxu1  ;;  %v1997_v55 = vpop.f32.mrb[10].mxu0 }
 0x183   : > { %v2072_v56 = vadd.f32 %v2071_v54, %v2070_v51  ;;  %v2073_v57 = vpop.f32.mrb[10].mxu1  ;;  %v1998_v58 = vpop.f32.mrb[11].mxu0 }
 0x184   : > { %v1999_v59 = vadd.f32 %v1998_v58, %v1997_v55  ;;  %v2074_v60 = vpop.f32.mrb[11].mxu1 }
 0x185   : > { %v2075_v61 = vadd.f32 %v2074_v60, %v2073_v57  ;;  %v2851_v62 = vadd.f32 %v2072_v56, %v1996_v53 }
 0x187   : > { %v2853_v63 = vadd.f32 %v2075_v61, %v1999_v59 }
 0x188   : > { %v2000_v0 = vpop.f32.mrb[12].mxu0 }
 0x189   : > { %v2076_v1 = vpop.f32.mrb[12].mxu1  ;;  %v2001_v2 = vpop.f32.mrb[13].mxu0 }
 0x18a   : > { %v2002_v3 = vadd.f32 %v2001_v2, %v2000_v0  ;;  %v2077_v4 = vpop.f32.mrb[13].mxu1  ;;  %v2003_v5 = vpop.f32.mrb[14].mxu0 }
 0x18b   : > { %v2078_v6 = vadd.f32 %v2077_v4, %v2076_v1  ;;  %v2079_v7 = vpop.f32.mrb[14].mxu1  ;;  %v2004_v8 = vpop.f32.mrb[15].mxu0 }
 0x18c   : > { %v2005_v9 = vadd.f32 %v2004_v8, %v2003_v5  ;;  %v2080_v10 = vpop.f32.mrb[15].mxu1 }
 0x18d   : > { %v2081_v11 = vadd.f32 %v2080_v10, %v2079_v7  ;;  %v2855_v12 = vadd.f32 %v2078_v6, %v2002_v3 }
 0x18f   : > { %v2857_v13 = vadd.f32 %v2081_v11, %v2005_v9 }
 0x190   : > { %v2006_v14 = vpop.f32.mrb[16].mxu0 }
 0x191   : > { %v2082_v15 = vpop.f32.mrb[16].mxu1  ;;  %v2007_v16 = vpop.f32.mrb[17].mxu0 }
 0x192   : > { %v2008_v17 = vadd.f32 %v2007_v16, %v2006_v14  ;;  %v2083_v18 = vpop.f32.mrb[17].mxu1  ;;  %v2009_v19 = vpop.f32.mrb[18].mxu0 }
 0x193   : > { %v2084_v20 = vadd.f32 %v2083_v18, %v2082_v15  ;;  %v2085_v21 = vpop.f32.mrb[18].mxu1  ;;  %v2010_v22 = vpop.f32.mrb[19].mxu0 }
 0x194   : > { %v2011_v23 = vadd.f32 %v2010_v22, %v2009_v19  ;;  %v2086_v24 = vpop.f32.mrb[19].mxu1 }
 0x195   : > { %v2087_v25 = vadd.f32 %v2086_v24, %v2085_v21  ;;  %v2859_v26 = vadd.f32 %v2084_v20, %v2008_v17 }
 0x197   : > { %v2861_v27 = vadd.f32 %v2087_v25, %v2011_v23 }
 0x198   : > { %v2012_v28 = vpop.f32.mrb[20].mxu0 }
 0x199   : > { %v2088_v29 = vpop.f32.mrb[20].mxu1  ;;  %v2013_v30 = vpop.f32.mrb[21].mxu0 }
 0x19a   : > { %v2014_v31 = vadd.f32 %v2013_v30, %v2012_v28  ;;  %v2089_v32 = vpop.f32.mrb[21].mxu1  ;;  %v2015_v33 = vpop.f32.mrb[22].mxu0 }
 0x19b   : > { %v2090_v36 = vadd.f32 %v2089_v32, %v2088_v29  ;;  %v2091_v37 = vpop.f32.mrb[22].mxu1  ;;  %v2016_v38 = vpop.f32.mrb[23].mxu0 }
 0x19c   : > { %v2017_v39 = vadd.f32 %v2016_v38, %v2015_v33  ;;  %v2092_v40 = vpop.f32.mrb[23].mxu1  ;;  %v2889_v33 = vld [vmem:[%s2886_s8 + $0x8] sm:$0xff]  }
 0x19d   : > { %v2093_v41 = vadd.f32 %v2092_v40, %v2091_v37  ;;  %v2863_v42 = vadd.f32 %v2090_v36, %v2014_v31  ;;  %v2895_v40 = vld [vmem:[%s2886_s8] sm:$0xff]  }
 0x19f   : > { %v2865_v43 = vadd.f32 %v2093_v41, %v2017_v39  ;;  %v2892_v39 = vld [vmem:[%s2886_s8 + $0x38] sm:$0xff]  }
 0x1a0   : > { %v2018_v44 = vpop.f32.mrb[24].mxu0 }
 0x1a1   : > { %v2094_v45 = vpop.f32.mrb[24].mxu1  ;;  %v2019_v46 = vpop.f32.mrb[25].mxu0 }
 0x1a2   : > { %v2020_v47 = vadd.f32 %v2019_v46, %v2018_v44  ;;  %v2095_v50 = vpop.f32.mrb[25].mxu1  ;;  %v2021_v51 = vpop.f32.mrb[26].mxu0  ;;  %v2898_v46 = vld [vmem:[%s2886_s8 + $0x30] sm:$0xff]  }
 0x1a3   : > { %v2096_v52 = vadd.f32 %v2095_v50, %v2094_v45  ;;  %v2097_v53 = vpop.f32.mrb[26].mxu1  ;;  %v2022_v54 = vpop.f32.mrb[27].mxu0 }
 0x1a4   : > { %v2023_v55 = vadd.f32 %v2022_v54, %v2021_v51  ;;  %v2098_v56 = vpop.f32.mrb[27].mxu1  ;;  %v1864_v51 = vunpack.c.l.bf16 %v2889_v33 }
 0x1a5   : > { %v2099_v57 = vadd.f32 %v2098_v56, %v2097_v53  ;;  %v2867_v58 = vadd.f32 %v2096_v52, %v2020_v47  ;;  %v2902_v52 = vld [vmem:[%s2886_s8 + $0x18] sm:$0xff]   ;;  %v2905_v53 = vld [vmem:[%s2886_s8 + $0x48] sm:$0xff]   ;;  %v1860_v56 = vunpack.c.l.bf16 %v2895_v40 }
 0x1a7   : > { %v2869_v59 = vadd.f32 %v2099_v57, %v2023_v55  ;;  %v1888_v55 = vunpack.c.l.bf16 %v2892_v39 }
 0x1a8   : > { %v2024_v60 = vpop.f32.mrb[28].mxu0 }
 0x1a9   : > { %v2100_v61 = vpop.f32.mrb[28].mxu1  ;;  %v2025_v0 = vpop.f32.mrb[29].mxu0 }
 0x1aa   : > { %v2026_v1 = vadd.f32 %v2025_v0, %v2024_v60  ;;  %v2101_v2 = vpop.f32.mrb[29].mxu1  ;;  %v2027_v3 = vpop.f32.mrb[30].mxu0  ;;  %v2916_v60 = vld [vmem:[%s2886_s8 + $0x10] sm:$0xff]   ;;  %v1884_v0 = vunpack.c.l.bf16 %v2898_v46 }
 0x1ab   : > { %v2102_v4 = vadd.f32 %v2101_v2, %v2100_v61  ;;  %v2103_v5 = vpop.f32.mrb[30].mxu1  ;;  %v2028_v6 = vpop.f32.mrb[31].mxu0  ;;  %v2919_v61 = vld [vmem:[%s2886_s8 + $0x40] sm:$0xff]   ;;  %v1889_v2 = vunpack.c.h.bf16 %v2892_v39 }
 0x1ac   : > { %v2029_v7 = vadd.f32 %v2028_v6, %v2027_v3  ;;  %v2104_v8 = vpop.f32.mrb[31].mxu1  ;;  %v1861_v3 = vunpack.c.h.bf16 %v2895_v40  ;;  %v1872_v6 = vunpack.c.l.bf16 %v2902_v52 }
 0x1ad   : > { %v2105_v9 = vadd.f32 %v2104_v8, %v2103_v5  ;;  %v2871_v10 = vadd.f32 %v2102_v4, %v2026_v1  ;;  %v1865_v1 = vunpack.c.h.bf16 %v2889_v33  ;;  %v2926_v4 = vld [vmem:[%s2886_s8 + $0x28] sm:$0xff]   ;;  %v1885_v5 = vunpack.c.h.bf16 %v2898_v46 }
 0x1af   : > { %v2873_v11 = vadd.f32 %v2105_v9, %v2029_v7  ;;  %v1896_v7 = vunpack.c.l.bf16 %v2905_v53  ;;  %v2938_v9 = vld [vmem:[%s2886_s8 + $0x20] sm:$0xff]   ;;  %s2456_s8 = sshll.u32 %s2548_s28, 4  ;;  %s2457_s8 = int_to_ptr.vmem [resolvable:$false] %s2456_s8 }
 0x1b0   : > { %v2030_v14 = vpop.f32.mrb[32].mxu0  ;;  %s2458_s25 = scalar_lea.vmem %s2457_s8, 2560  ;;  %p2459_p3 = scmp.lt.s32.totalorder %s3058_s6, %s2457_s8 }
 0x1b1   : > { %v2106_v15 = vpop.f32.mrb[32].mxu1  ;;  %v2031_v16 = vpop.f32.mrb[33].mxu0  ;;  %p2460_p5 = scmp.lt.s32.totalorder %s2458_s25, %s2452_s21 }
 0x1b2   : > { %v2032_v17 = vadd.f32 %v2031_v16, %v2030_v14  ;;  %v2107_v18 = vpop.f32.mrb[33].mxu1  ;;  %v2033_v19 = vpop.f32.mrb[34].mxu0  ;;  %v1868_v16 = vunpack.c.l.bf16 %v2916_v60 }
 0x1b3   : > { %v2108_v20 = vadd.f32 %v2107_v18, %v2106_v15  ;;  %v2109_v21 = vpop.f32.mrb[34].mxu1  ;;  %v2034_v22 = vpop.f32.mrb[35].mxu0  ;;  %v2940_v15 = vld [vmem:[%s346_s26] ss:$0 sm:$0xff]  ;;  %v1873_v18 = vunpack.c.h.bf16 %v2902_v52  ;;  %p2461_p0 = por %p2460_p5, %p2459_p3 }
 0x1b4   : > { %v2035_v23 = vadd.f32 %v2034_v22, %v2033_v19  ;;  %v2110_v24 = vpop.f32.mrb[35].mxu1  ;;  %v1897_v19 = vunpack.c.h.bf16 %v2905_v53 }
 0x1b5   : > { %v2111_v25 = vadd.f32 %v2110_v24, %v2109_v21  ;;  %v2877_v28 = vadd.f32 %v2108_v20, %v2032_v17  ;;  %v1892_v17 = vunpack.c.l.bf16 %v2919_v61  ;;  %v1893_v24 = vunpack.c.h.bf16 %v2919_v61  ;;  %p2462_p8 = pnand %p2461_p0, %p2455_p10 }
 0x1b7   : > { %v2879_v29 = vadd.f32 %v2111_v25, %v2035_v23  ;;  %v1869_v23 = vunpack.c.h.bf16 %v2916_v60  ;;  %v1880_v25 = vunpack.c.l.bf16 %v2926_v4 }
 0x1b8   : > { %v2036_v30 = vpop.f32.mrb[36].mxu0 }
 0x1b9   : > { %v2112_v31 = vpop.f32.mrb[36].mxu1  ;;  %v2037_v32 = vpop.f32.mrb[37].mxu0 }
 0x1ba   : > { %v2038_v36 = vadd.f32 %v2037_v32, %v2036_v30  ;;  %v2113_v37 = vpop.f32.mrb[37].mxu1  ;;  %v2039_v38 = vpop.f32.mrb[38].mxu0  ;;  %v2950_v30 = vld [vmem:[%s349_s11] ss:$0 sm:$0xff] }
 0x1bb   : > { %v2114_v41 = vadd.f32 %v2113_v37, %v2112_v31  ;;  %v2115_v44 = vpop.f32.mrb[38].mxu1  ;;  %v2040_v45 = vpop.f32.mrb[39].mxu0  ;;  %v1876_v37 = vunpack.c.l.bf16 %v2938_v9 }
 0x1bc   : > { %v2041_v47 = vadd.f32 %v2040_v45, %v2039_v38  ;;  %v2116_v50 = vpop.f32.mrb[39].mxu1 }
 0x1bd   : > { %v2117_v54 = vadd.f32 %v2116_v50, %v2115_v44  ;;  %v2913_v57 = vadd.f32 %v2114_v41, %v2038_v36 }
 0x1bf   : > { %v2935_v8 = vadd.f32 %v2117_v54, %v2041_v47 }
 0x1c0   : > { %v2142_v14 = vpop.f32.mrb[40].mxu0 }
 0x1c1   : > { %v1251_v20 = vadd.f32 %v2142_v14, %v2847_v48  ;;  %v2154_v21 = vpop.f32.mrb[40].mxu1  ;;  %v1242_v22 = vpop.f32.mrb[41].mxu0  ;;  %v1881_v48 = vunpack.c.h.bf16 %v2926_v4 }
 0x1c2   : > { %v1299_v31 = vadd.f32 %v2154_v21, %v2871_v10  ;;  %v1243_v32 = vadd.f32 %v1242_v22, %v2843_v34  ;;  %v1290_v33 = vpop.f32.mrb[41].mxu1  ;;  %v2143_v36 = vpop.f32.mrb[42].mxu0 }
 0x1c3   : > { %v1330_v38 = vmul.f32 %v2940_v15, %v1251_v20  ;;  %v1291_v41 = vadd.f32 %v1290_v33, %v2867_v58  ;;  %v1254_v44 = vadd.f32 %v2143_v36, %v2849_v49  ;;  %v2155_v45 = vpop.f32.mrb[42].mxu1  ;;  %v1245_v47 = vpop.f32.mrb[43].mxu0 }
 0x1c4   : > { %v1342_v10 = vmul.f32 %v2940_v15, %v1299_v31  ;;  %v1328_v34 = vmul.f32 %v2940_v15, %v1243_v32  ;;  %v1302_v54 = vadd.f32 %v2155_v45, %v2873_v11  ;;  %v1246_v14 = vadd.f32 %v1245_v47, %v2845_v35  ;;  %v1293_v21 = vpop.f32.mrb[43].mxu1 }
 0x1c5   : > { %v1357_v22 = vadd.f32 %v2950_v30, %v1330_v38  ;;  %v1340_v20 = vmul.f32 %v2940_v15, %v1291_v41  ;;  %v1331_v58 = vmul.f32 %v2940_v15, %v1254_v44  ;;  %v1294_v49 = vadd.f32 %v1293_v21, %v2869_v59 }
 0x1c6   : > { %v1369_v33 = vadd.f32 %v2950_v30, %v1342_v10  ;;  %v1355_v36 = vadd.f32 %v2950_v30, %v1328_v34  ;;  %v1343_v31 = vmul.f32 %v2940_v15, %v1302_v54  ;;  %v1329_v32 = vmul.f32 %v2940_v15, %v1246_v14 }
 0x1c7   : > { %v1417_v11 = vadd.f32 %v1864_v51, %v1357_v22  ;;  %v1367_v35 = vadd.f32 %v2950_v30, %v1340_v20  ;;  %v1358_v45 = vadd.f32 %v2950_v30, %v1331_v58  ;;  %v1341_v38 = vmul.f32 %v2940_v15, %v1294_v49 }
 0x1c8   : > { %v1429_v41 = vadd.f32 %v1888_v55, %v1369_v33  ;;  %v1415_v47 = vadd.f32 %v1860_v56, %v1355_v36  ;;  %v1370_v44 = vadd.f32 %v2950_v30, %v1343_v31  ;;  %v1356_v59 = vadd.f32 %v2950_v30, %v1329_v32  ;;  %v2146_v10 = vpop.f32.mrb[44].mxu0 }
 0x1c9   : > { %v1437_v21 = vmax.f32 %v1417_v11, 0.0  ;;  %v1427_v34 = vadd.f32 %v1884_v0, %v1367_v35  ;;  %v1418_v50 = vadd.f32 %v1865_v1, %v1358_v45  ;;  %v1368_v54 = vadd.f32 %v2950_v30, %v1341_v38  ;;  %v2158_v14 = vpop.f32.mrb[44].mxu1  ;;  %v1258_v51 = vpop.f32.mrb[45].mxu0 }
 0x1ca   : > { %v1449_v22 = vmax.f32 %v1429_v41, 0.0  ;;  %v1435_v20 = vmax.f32 %v1415_v47, 0.0  ;;  %v1430_v58 = vadd.f32 %v1889_v2, %v1370_v44  ;;  %v1416_v55 = vadd.f32 %v1861_v3, %v1356_v59  ;;  %v1306_v56 = vpop.f32.mrb[45].mxu1  ;;  %v2147_v49 = vpop.f32.mrb[46].mxu0 }
 0x1cb   : > { %v1447_v33 = vmax.f32 %v1427_v34, 0.0  ;;  %v1438_v36 = vmax.f32 %v1418_v50, 0.0  ;;  %v1428_v0 = vadd.f32 %v1885_v5, %v1368_v54  ;;  %v1267_v1 = vadd.f32 %v2146_v10, %v2855_v12  ;;  %v2159_v31 = vpop.f32.mrb[46].mxu1  ;;  %v1261_v32 = vpop.f32.mrb[47].mxu0 }
 0x1cc   : > { %v1450_v11 = vmax.f32 %v1430_v58, 0.0  ;;  %v1436_v35 = vmax.f32 %v1416_v55, 0.0  ;;  %v1315_v39 = vadd.f32 %v2158_v14, %v2913_v57  ;;  %v1259_v2 = vadd.f32 %v1258_v51, %v2851_v62  ;;  %v1309_v40 = vpop.f32.mrb[47].mxu1 }
 0x1cd   : > { %v1906_v3 = vpack.c.bf16 %v1438_v36, %v1437_v21  ;;  %v1448_v45 = vmax.f32 %v1428_v0, 0.0  ;;  %v1334_v38 = vmul.f32 %v2940_v15, %v1267_v1  ;;  %v1307_v50 = vadd.f32 %v1306_v56, %v2877_v28 }
 0x1ce   : > { %v1936_v46 = vpack.c.bf16 %v1450_v11, %v1449_v22  ;;  %v1901_v5 = vpack.c.bf16 %v1436_v35, %v1435_v20  ;;  %v1346_v12 = vmul.f32 %v2940_v15, %v1315_v39  ;;  %v1332_v41 = vmul.f32 %v2940_v15, %v1259_v2 }
 0x1cf   : > { %1957 = vst [vmem:[%s2993_s15 + $0x8] sm:$0xff] %v1906_v3   ;;  %v1931_v62 = vpack.c.bf16 %v1448_v45, %v1447_v33  ;;  %v1361_v57 = vadd.f32 %v2950_v30, %v1334_v38  ;;  %v1344_v47 = vmul.f32 %v2940_v15, %v1307_v50  ;;  %v1270_v28 = vadd.f32 %v2147_v49, %v2857_v13 }
 0x1d0   : > { %1963 = vst [vmem:[%s2993_s15 + $0x38] sm:$0xff] %v1936_v46   ;;  %1902 = vst [vmem:[%s2993_s15] sm:$0xff] %v1901_v5   ;;  %v1373_v44 = vadd.f32 %v2950_v30, %v1346_v12  ;;  %v1359_v59 = vadd.f32 %v2950_v30, %v1332_v41  ;;  %v1318_v10 = vadd.f32 %v2159_v31, %v2935_v8  ;;  %v2150_v34 = vpop.f32.mrb[48].mxu0  ;;  %v3143_v41 = vunpack.c.h.bf16 %v2938_v9 }
 0x1d1   : > { %v1262_v21 = vadd.f32 %v1261_v32, %v2853_v63  ;;  %1962 = vst [vmem:[%s2993_s15 + $0x30] sm:$0xff] %v1931_v62   ;;  %v1421_v54 = vadd.f32 %v1872_v6, %v1361_v57  ;;  %v1371_v14 = vadd.f32 %v2950_v30, %v1344_v47  ;;  %v1335_v51 = vmul.f32 %v2940_v15, %v1270_v28  ;;  %v1274_v22 = vpop.f32.mrb[49].mxu0 }
 0x1d2   : > { %v1310_v13 = vadd.f32 %v1309_v40, %v2879_v29  ;;  %v1433_v20 = vadd.f32 %v1896_v7, %v1373_v44  ;;  %v1419_v8 = vadd.f32 %v1868_v16, %v1359_v59  ;;  %v1347_v63 = vmul.f32 %v2940_v15, %v1318_v10  ;;  %v2151_v55 = vpop.f32.mrb[50].mxu0 }
 0x1d3   : > { %v1333_v58 = vmul.f32 %v2940_v15, %v1262_v21  ;;  %v1441_v56 = vmax.f32 %v1421_v54, 0.0  ;;  %v1431_v6 = vadd.f32 %v1892_v17, %v1371_v14  ;;  %v1362_v49 = vadd.f32 %v2950_v30, %v1335_v51  ;;  %v1277_v33 = vpop.f32.mrb[51].mxu0 }
 0x1d4   : > { %v1345_v29 = vmul.f32 %v2940_v15, %v1310_v13  ;;  %v1453_v36 = vmax.f32 %v1433_v20, 0.0  ;;  %v1439_v0 = vmax.f32 %v1419_v8, 0.0  ;;  %v1374_v7 = vadd.f32 %v2950_v30, %v1347_v63 }
 0x1d5   : > { %v1360_v16 = vadd.f32 %v2950_v30, %v1333_v58  ;;  %v1451_v1 = vmax.f32 %v1431_v6, 0.0  ;;  %v1422_v31 = vadd.f32 %v1873_v18, %v1362_v49  ;;  %v1283_v11 = vadd.f32 %v2150_v34, %v2863_v42 }
 0x1d6   : > { %v1372_v32 = vadd.f32 %v2950_v30, %v1345_v29  ;;  %v1434_v17 = vadd.f32 %v1897_v19, %v1374_v7  ;;  %v1275_v39 = vadd.f32 %v1274_v22, %v2859_v26  ;;  %v1286_v2 = vadd.f32 %v2151_v55, %v2865_v43 }
 0x1d7   : > { %v1420_v35 = vadd.f32 %v1869_v23, %v1360_v16  ;;  %v1442_v40 = vmax.f32 %v1422_v31, 0.0  ;;  %v1338_v18 = vmul.f32 %v2940_v15, %v1283_v11  ;;  %v1278_v3 = vadd.f32 %v1277_v33, %v2861_v27 }
 0x1d8   : > { %v1432_v52 = vadd.f32 %v1893_v24, %v1372_v32  ;;  %v1454_v42 = vmax.f32 %v1434_v17, 0.0  ;;  %v1336_v60 = vmul.f32 %v2940_v15, %v1275_v39  ;;  %v1339_v26 = vmul.f32 %v2940_v15, %v1286_v2 }
 0x1d9   : > { %v1440_v53 = vmax.f32 %v1420_v35, 0.0  ;;  %v1916_v19 = vpack.c.bf16 %v1442_v40, %v1441_v56  ;;  %v1365_v61 = vadd.f32 %v2950_v30, %v1338_v18  ;;  %v1337_v23 = vmul.f32 %v2940_v15, %v1278_v3 }
 0x1da   : > { %v1452_v43 = vmax.f32 %v1432_v52, 0.0  ;;  %v1946_v24 = vpack.c.bf16 %v1454_v42, %v1453_v36  ;;  %v1363_v27 = vadd.f32 %v2950_v30, %v1336_v60  ;;  %v1366_v38 = vadd.f32 %v2950_v30, %v1339_v26 }
 0x1db   : > { %v1911_v45 = vpack.c.bf16 %v1440_v53, %v1439_v0  ;;  %1959 = vst [vmem:[%s2993_s15 + $0x18] sm:$0xff] %v1916_v19   ;;  %v1425_v46 = vadd.f32 %v1880_v25, %v1365_v61  ;;  %v1364_v5 = vadd.f32 %v2950_v30, %v1337_v23 }
 0x1dc   : > { %v1941_v50 = vpack.c.bf16 %v1452_v43, %v1451_v1  ;;  %1965 = vst [vmem:[%s2993_s15 + $0x48] sm:$0xff] %v1946_v24   ;;  %v1423_v15 = vadd.f32 %v1876_v37, %v1363_v27  ;;  %v1426_v12 = vadd.f32 %v1881_v48, %v1366_v38 }
 0x1dd   : > { %1958 = vst [vmem:[%s2993_s15 + $0x10] sm:$0xff] %v1911_v45   ;;  %v1424_v62 = vadd.f32 %v3143_v41, %v1364_v5  ;;  %v1445_v25 = vmax.f32 %v1425_v46, 0.0 }
 0x1de   : > { %1964 = vst [vmem:[%s2993_s15 + $0x40] sm:$0xff] %v1941_v50   ;;  %v1446_v30 = vmax.f32 %v1426_v12, 0.0  ;;  %v1443_v57 = vmax.f32 %v1423_v15, 0.0 }
 0x1df   : > { %v1444_v47 = vmax.f32 %v1424_v62, 0.0 }
 0x1e0   : > { %v1926_v28 = vpack.c.bf16 %v1446_v30, %v1445_v25 }
 0x1e1   : > { %v1921_v4 = vpack.c.bf16 %v1444_v47, %v1443_v57 }
 0x1e2   : > { %1961 = vst [vmem:[%s2993_s15 + $0x28] sm:$0xff] %v1926_v28  }
 0x1e3   : > { %1960 = vst [vmem:[%s2993_s15 + $0x20] sm:$0xff] %v1921_v4  }
 0x1e4   : > { %2465 = shalt.err (!%p2462_p8)
}
 0x1e5   : > { %s2466_s13 = scalar_lea.hbm %s3063_s14, 1280  ;;  %s2470_s1 = scalar_lea.hbm %s3118_s5, 3840 }
 0x1e6   : > { %p2467_p9 = scmp.ne.s32.totalorder %s3063_s14, %s2466_s13  ;;  %p2471_p2 = scmp.lt.u32.totalorder %s3063_s14, %s3118_s5 }
 0x1e7   : > { %p2472_p12 = scmp.lt.u32.totalorder %s2470_s1, %s2466_s13  ;;  %p2474_p6 = scmp.lt.u32.totalorder %s2466_s13, %s3063_s14 }
 0x1e8   : > { %p2468_p4 = pnand %p2467_p9, %p3144_p11 }
 0x1e9   : > { %p2473_p1 = por %p2472_p12, %p2471_p2 }
 0x1ea   : > { %p2469_p7 = pneg %p2468_p4 }
 0x1eb   : > { %p2475_p13 = por %p2474_p6, %p2473_p1 }
 0x1ed   : > { %p2476_p10 = pnand %p2475_p13, %p2469_p7 }
 0x1ef   : > { %2479 = shalt.err (!%p2476_p10)
}
 0x1f0   : > { %s2549_s17 = smov 64   ;;  %s2550_s16 = smov 192  }
 0x1f1   : > { %s2551_s10 = smov 4  }
 0x1f2   : > { %2180 = dma.vmem_to_hbm [thread:$0]  (%p3144_p11), %s3058_s6, 1280, %s3063_s14, %s1556_s27, %s2549_s17, %s2550_s16, %s2551_s10  }
 0x1f3 PF: > { %p2200_p3 = scmp.ge.s32.totalorder %s2538_s23, 2  ;;  %s1586_s21 = sand.u32 1, %s2518_s18  }
 0x1f4   : > { %p3145_p5 = scmp.ne.s32.totalorder %s3131_s9, 0  ;;  %s1587_s28 = scalar_lea.sflag [#allocation4], %s1586_s21 }
 0x1f6   : > { %p2194_p0 = pnand %p2200_p3, %p3145_p5 }
 0x1f8   : > { %2513 = dma.done.wait (!%p2194_p0), %s1587_s28, 1280  }
 0x1f9   : > { %2515 = vsyncadd (!%p2194_p0), %s1587_s28, 4294966016  ;;  %s22_s23 = sadd.s32 1, %s2538_s23   ;;  %s3146_s18 = smov %s2522_s19 }
 0x1fa   : > { %p19_p8 = scmp.ge.s32.totalorder %s22_s23, 5   ;;  %s3147_s19 = smov %s2526_s20 }
 0x1fb   : > { %s3148_s20 = smov %s2629_s30  ;;  %s3149_s21 = smov %s2534_s22 }
 0x1fc   : > { %s3150_s22 = smov %s3152_s24  ;;  %21 = sbr.rel (!%p19_p8) target bundleno = 9 (0x9), region = 108 }
 0x203   :  { %1592 = vsyncpa [#allocation3], 1 }
 0x204   :  { %1594 = vsyncpa [#allocation3 + $0x1], 1 }
 0x205   :  { %1595 = vsyncpa [#allocation6], 1 }
 0x206   :  { %1597 = vsyncpa [#allocation6 + $0x1], 1 }
 0x207   :  { %1598 = vsyncpa [#allocation4], 1 }
 0x208   :  { %1600 = vsyncpa [#allocation4 + $0x1], 1 }

</bundles_post_ra>
